<compile_context>
chip_gen: v7x
topology: tpu7x:2x2x1
jax: 0.10.0
libtpu: 0.0.40
codegen_flags: <defaults>
</compile_context>

<pallas_src>
import functools

import jax
import jax.numpy as jnp
from jax import lax
from jax.experimental import pallas as pl
from jax.experimental.pallas import tpu as pltpu


def mhp_kernel(key_ref, val_ref, wk_ref, bk_ref, wv_ref, bv_ref,
               wf_ref, bf_ref, out_ref, *, Bt, S, H, d):
    D = H * d

    k2 = key_ref[...]            # (Bt*S, D)  bf16
    v2 = val_ref[...]            # (Bt*S, D)  bf16

    # --- projections: single big 2-D MXU matmuls, f32 accumulation ---------------
    scores_flat = jnp.dot(k2, wk_ref[...],
                          preferred_element_type=jnp.float32) + bk_ref[...]   # (Bt*S, H)
    vals_flat = jnp.dot(v2, wv_ref[...],
                        preferred_element_type=jnp.float32) + bv_ref[...]     # (Bt*S, D)

    scores = scores_flat.reshape(Bt, S, H)       # split leading (sublane-aligned) dim
    vals = vals_flat.reshape(Bt, S, D)

    # --- softmax over the sequence axis, per (batch, head), in f32 ---------------
    m = jnp.max(scores, axis=1, keepdims=True)                       # (Bt, 1, H)
    e = jnp.exp(scores - m)                                          # (Bt, S, H)
    denom = jnp.sum(e, axis=1, keepdims=True)                        # (Bt, 1, H)
    attn = e * pl.reciprocal(denom, approx=True)                     # (Bt, S, H)

    # --- pooling on the MXU: ctxfull[b,h,:] = sum_s attn[b,s,h] * vals[b,s,:] ----
    attn_t = jnp.swapaxes(attn, 1, 2).astype(jnp.bfloat16)           # (Bt, H, S)
    ctxfull = jnp.einsum('bhs,bsd->bhd', attn_t, vals.astype(jnp.bfloat16),
                         preferred_element_type=jnp.float32)         # (Bt, H, D)

    # keep only head h's own d-slice of the head-major columns:
    #   mask[h, c] = 1  iff  h*d <= c < (h+1)*d
    col = lax.broadcasted_iota(jnp.int32, (H, D), 1)
    row = lax.broadcasted_iota(jnp.int32, (H, D), 0)
    head_mask = (col >= row * d) & (col < (row + 1) * d)
    context = jnp.sum(jnp.where(head_mask[None, :, :], ctxfull, 0.0), axis=1)  # (Bt, D)

    # --- final linear (weight pre-permuted + lane-padded in the wrapper) ---------
    out = jnp.dot(context.astype(jnp.bfloat16), wf_ref[...],
                  preferred_element_type=jnp.float32) + bf_ref[...]  # (Bt, Dout_p)
    out_ref[...] = out.astype(out_ref.dtype)


def multi_headed_pooling(key, value, params, num_heads, *, block_b=8):
    """key, value: (B, S, D) float32.  Returns (B, 1, model_dim_out) float32."""
    B, S, D = key.shape
    H = num_heads
    d = D // H

    Wk, bk = params["Wk"], params["bk"]        # (H, D), (H,)      -- PyTorch Linear layout
    Wv, bv = params["Wv"], params["bv"]        # (D, D), (D,)
    Wf, bf = params["Wf"], params["bf"]        # (Dout, D), (Dout,)
    Dout = Wf.shape[0]

    Bt = block_b
    B_pad = ((B + Bt - 1) // Bt) * Bt          # batch rows per grid step (>= 8 sublanes)
    Dout_p = ((Dout + 127) // 128) * 128       # lane-dense output block

    # Pre-transpose weights to (in, out) for `x @ W`; cast to bf16 (halves HBM traffic).
    wk_t = Wk.T.astype(jnp.bfloat16)                                     # (D, H)
    wv_t = Wv.T.astype(jnp.bfloat16)                                     # (D, D)
    # PyTorch unshape on (B,H,d) does a d-major flatten: ci[j*H + h] = ctx[h, j].
    # Fold that permutation into the final weight (row h*d+j of Wf^T := row j*H+h),
    # and zero-pad columns up to Dout_p for a lane-dense output store.
    wf_t_perm = Wf.T.reshape(d, H, Dout).transpose(1, 0, 2).reshape(D, Dout)
    wf_t_perm = jnp.pad(wf_t_perm, ((0, 0), (0, Dout_p - Dout))).astype(jnp.bfloat16)

    bk2 = bk.reshape(1, H).astype(jnp.float32)
    bv2 = bv.reshape(1, D).astype(jnp.float32)
    bf2 = jnp.pad(bf, (0, Dout_p - Dout)).reshape(1, Dout_p).astype(jnp.float32)

    # Pad the batch to a multiple of Bt, then flatten (B,S,D) -> (B*S, D) so the kernel
    # sees plain 2-D (Bt*S, D) blocks.
    if B_pad != B:
        pad = ((0, B_pad - B), (0, 0), (0, 0))
        key = jnp.pad(key, pad)
        value = jnp.pad(value, pad)
    key2 = key.reshape(B_pad * S, D).astype(jnp.bfloat16)
    value2 = value.reshape(B_pad * S, D).astype(jnp.bfloat16)

    kernel = functools.partial(mhp_kernel, Bt=Bt, S=S, H=H, d=d)

    out = pl.pallas_call(
        kernel,
        out_shape=jax.ShapeDtypeStruct((B_pad, Dout_p), jnp.float32),
        grid=(B_pad // Bt,),
        in_specs=[
            pl.BlockSpec((Bt * S, D), lambda b: (b, 0)),    # key   (flattened)
            pl.BlockSpec((Bt * S, D), lambda b: (b, 0)),    # value (flattened)
            pl.BlockSpec((D, H), lambda b: (0, 0)),         # Wk^T        (grid-invariant)
            pl.BlockSpec((1, H), lambda b: (0, 0)),         # bk
            pl.BlockSpec((D, D), lambda b: (0, 0)),         # Wv^T
            pl.BlockSpec((1, D), lambda b: (0, 0)),         # bv
            pl.BlockSpec((D, Dout_p), lambda b: (0, 0)),    # Wf^T (permuted, padded)
            pl.BlockSpec((1, Dout_p), lambda b: (0, 0)),    # bf   (padded)
        ],
        out_specs=pl.BlockSpec((Bt, Dout_p), lambda b: (b, 0)),
        compiler_params=pltpu.CompilerParams(
            dimension_semantics=("parallel",),
            vmem_limit_bytes=64 * 1024 * 1024,
        ),
    )(key2, value2, wk_t, bk2, wv_t, bv2, wf_t_perm, bf2)

    return out[:B, :Dout][:, None, :]   # (B, 1, Dout)


def reference_forward(key, value, params, num_heads):
    """Pure-JAX f32 replica of the PyTorch forward (eval dropout), for verification."""
    B, S, D = key.shape
    H = num_heads
    d = D // H
    Wk, bk = params["Wk"], params["bk"]
    Wv, bv = params["Wv"], params["bv"]
    Wf, bf = params["Wf"], params["bf"]

    scores = key @ Wk.T + bk                                            # (B, S, H)
    vals = value @ Wv.T + bv                                            # (B, S, D)
    scores = scores.reshape(B, S, H, 1).transpose(0, 2, 1, 3)[..., 0]   # (B, H, S)
    vals = vals.reshape(B, S, H, d).transpose(0, 2, 1, 3)               # (B, H, S, d)
    attn = jax.nn.softmax(scores, axis=-1)
    context = jnp.sum(attn[..., None] * vals, axis=-2)                  # (B, H, d)
    context = context.transpose(0, 2, 1).reshape(B, H * d)              # d-major flatten
    out = context @ Wf.T + bf
    return out[:, None, :]


if __name__ == "__main__":
    B, S, D, H = 16, 8, 32, 4       # batch, seq, model_dim, num_heads
    Dout = D                        # model_dim_out defaults to model_dim

    root = jax.random.PRNGKey(0)
    k1, k2, k3, k4, k5, k6, k7, k8 = jax.random.split(root, 8)

    params = {
        "Wk": 0.1 * jax.random.normal(k1, (H, D), jnp.float32),
        "bk": 0.1 * jax.random.normal(k2, (H,), jnp.float32),
        "Wv": 0.1 * jax.random.normal(k3, (D, D), jnp.float32),
        "bv": 0.1 * jax.random.normal(k4, (D,), jnp.float32),
        "Wf": 0.1 * jax.random.normal(k5, (Dout, D), jnp.float32),
        "bf": 0.1 * jax.random.normal(k6, (Dout,), jnp.float32),
    }

    key_in = jax.random.normal(k7, (B, S, D), jnp.float32)
    value_in = jax.random.normal(k8, (B, S, D), jnp.float32)

    out = multi_headed_pooling(key_in, value_in, params, num_heads=H)
    out = jax.block_until_ready(out)

    ref = reference_forward(key_in, value_in, params, num_heads=H)
    assert out.shape == (B, 1, Dout), out.shape
    # bf16 weights/activations inside the kernel -> relaxed tolerance vs f32 reference.
    assert jnp.allclose(out, ref, atol=2e-2, rtol=2e-2), "mismatch vs reference"

    print("KERNEL_OK")
</pallas_src>

<mosaic_0001>
module attributes {stable_mosaic.version = 11 : i64} {
  func.func @mhp_kernel(%arg0: i32, %arg1: memref<64x32xbf16, #tpu.memory_space<vmem>>, %arg2: memref<64x32xbf16, #tpu.memory_space<vmem>>, %arg3: memref<32x4xbf16, #tpu.memory_space<vmem>>, %arg4: memref<1x4xf32, #tpu.memory_space<vmem>>, %arg5: memref<32x32xbf16, #tpu.memory_space<vmem>>, %arg6: memref<1x32xf32, #tpu.memory_space<vmem>>, %arg7: memref<32x128xbf16, #tpu.memory_space<vmem>>, %arg8: memref<1x128xf32, #tpu.memory_space<vmem>>, %arg9: memref<8x128xf32, #tpu.memory_space<vmem>>) attributes {dimension_semantics = [#tpu.dimension_semantics<parallel>], iteration_bounds = array<i64: 2>, scalar_prefetch = 0 : i64, scratch_operands = 0 : i64, tpu.core_type = #tpu.core_type<tc>, window_params = [{transform_indices = @transform_0, window_bounds = array<i64: 64, 32>}, {transform_indices = @transform_1, window_bounds = array<i64: 64, 32>}, {pipeline_mode = #tpu.pipeline_mode<synchronous>, transform_indices = @transform_2, window_bounds = array<i64: 32, 4>}, {pipeline_mode = #tpu.pipeline_mode<synchronous>, transform_indices = @transform_3, window_bounds = array<i64: 1, 4>}, {pipeline_mode = #tpu.pipeline_mode<synchronous>, transform_indices = @transform_4, window_bounds = array<i64: 32, 32>}, {pipeline_mode = #tpu.pipeline_mode<synchronous>, transform_indices = @transform_5, window_bounds = array<i64: 1, 32>}, {pipeline_mode = #tpu.pipeline_mode<synchronous>, transform_indices = @transform_6, window_bounds = array<i64: 32, 128>}, {pipeline_mode = #tpu.pipeline_mode<synchronous>, transform_indices = @transform_7, window_bounds = array<i64: 1, 128>}, {transform_indices = @transform_8, window_bounds = array<i64: 8, 128>}]} {
    %c0 = arith.constant 0 : index
    %c0_0 = arith.constant 0 : index
    %0 = vector.load %arg1[%c0, %c0_0] : memref<64x32xbf16, #tpu.memory_space<vmem>>, vector<64x32xbf16>
    %c0_1 = arith.constant 0 : index
    %c0_2 = arith.constant 0 : index
    %1 = vector.load %arg2[%c0_1, %c0_2] : memref<64x32xbf16, #tpu.memory_space<vmem>>, vector<64x32xbf16>
    %c0_3 = arith.constant 0 : index
    %c0_4 = arith.constant 0 : index
    %2 = vector.load %arg3[%c0_3, %c0_4] : memref<32x4xbf16, #tpu.memory_space<vmem>>, vector<32x4xbf16>
    %cst = arith.constant dense<0.000000e+00> : vector<64x4xf32>
    %3 = tpu.matmul %0, %2, %cst {dimension_numbers = #tpu.dot_dimension_numbers<[1], [0], [0], [1], [0, 0, 1, 1], [], []>} : vector<64x32xbf16>, vector<32x4xbf16>, vector<64x4xf32> -> vector<64x4xf32>
    %c0_5 = arith.constant 0 : index
    %c0_6 = arith.constant 0 : index
    %4 = vector.load %arg4[%c0_5, %c0_6] : memref<1x4xf32, #tpu.memory_space<vmem>>, vector<1x4xf32>
    %5 = vector.broadcast %4 : vector<1x4xf32> to vector<64x4xf32>
    %6 = arith.addf %3, %5 : vector<64x4xf32>
    %c0_7 = arith.constant 0 : index
    %c0_8 = arith.constant 0 : index
    %7 = vector.load %arg5[%c0_7, %c0_8] : memref<32x32xbf16, #tpu.memory_space<vmem>>, vector<32x32xbf16>
    %cst_9 = arith.constant dense<0.000000e+00> : vector<64x32xf32>
    %8 = tpu.matmul %1, %7, %cst_9 {dimension_numbers = #tpu.dot_dimension_numbers<[1], [0], [0], [1], [0, 0, 1, 1], [], []>} : vector<64x32xbf16>, vector<32x32xbf16>, vector<64x32xf32> -> vector<64x32xf32>
    %c0_10 = arith.constant 0 : index
    %c0_11 = arith.constant 0 : index
    %9 = vector.load %arg6[%c0_10, %c0_11] : memref<1x32xf32, #tpu.memory_space<vmem>>, vector<1x32xf32>
    %10 = vector.broadcast %9 : vector<1x32xf32> to vector<64x32xf32>
    %11 = arith.addf %8, %10 : vector<64x32xf32>
    %12 = vector.shape_cast %6 : vector<64x4xf32> to vector<8x8x4xf32>
    %13 = vector.shape_cast %11 : vector<64x32xf32> to vector<8x8x32xf32>
    %cst_12 = arith.constant dense<0xFF800000> : vector<8x4xf32>
    %14 = vector.multi_reduction <maximumf>, %12, %cst_12 [1] : vector<8x8x4xf32> to vector<8x4xf32>
    %15 = vector.shape_cast %14 : vector<8x4xf32> to vector<8x1x4xf32>
    %16 = vector.broadcast %15 : vector<8x1x4xf32> to vector<8x8x4xf32>
    %17 = arith.subf %12, %16 : vector<8x8x4xf32>
    %18 = math.exp %17 : vector<8x8x4xf32>
    %cst_13 = arith.constant dense<0.000000e+00> : vector<8x4xf32>
    %19 = vector.multi_reduction <add>, %18, %cst_13 [1] : vector<8x8x4xf32> to vector<8x4xf32>
    %20 = vector.shape_cast %19 : vector<8x4xf32> to vector<8x1x4xf32>
    %21 = tpu.reciprocal %20 {approx = true} : vector<8x1x4xf32> -> vector<8x1x4xf32>
    %22 = vector.broadcast %21 : vector<8x1x4xf32> to vector<8x8x4xf32>
    %23 = arith.mulf %18, %22 : vector<8x8x4xf32>
    %24 = tpu.transpose %23, [0, 2, 1] : vector<8x8x4xf32> -> vector<8x4x8xf32>
    %25 = arith.truncf %24 : vector<8x4x8xf32> to vector<8x4x8xbf16>
    %26 = arith.truncf %13 : vector<8x8x32xf32> to vector<8x8x32xbf16>
    "tpu.trace_start"() <{level = 10 : i32, message = "bhs,bsd->bhd"}> : () -> ()
    %cst_14 = arith.constant dense<0.000000e+00> : vector<8x4x32xf32>
    %27 = tpu.matmul %25, %26, %cst_14 {dimension_numbers = #tpu.dot_dimension_numbers<[2], [1], [1], [2], [0, 0, 0, 1, 1, 2], [0], [0]>} : vector<8x4x8xbf16>, vector<8x8x32xbf16>, vector<8x4x32xf32> -> vector<8x4x32xf32>
    "tpu.trace_stop"() : () -> ()
    %28 = tpu.iota {dimensions = array<i32: 1>} : vector<4x32xi32>
    %29 = tpu.iota {dimensions = array<i32: 0>} : vector<4x32xi32>
    %c8_i32 = arith.constant 8 : i32
    %30 = vector.broadcast %c8_i32 : i32 to vector<4x32xi32>
    %31 = arith.muli %29, %30 : vector<4x32xi32>
    %32 = arith.cmpi sge, %28, %31 : vector<4x32xi32>
    %c1_i32 = arith.constant 1 : i32
    %33 = vector.broadcast %c1_i32 : i32 to vector<4x32xi32>
    %34 = arith.addi %29, %33 : vector<4x32xi32>
    %c8_i32_15 = arith.constant 8 : i32
    %35 = vector.broadcast %c8_i32_15 : i32 to vector<4x32xi32>
    %36 = arith.muli %34, %35 : vector<4x32xi32>
    %37 = arith.cmpi slt, %28, %36 : vector<4x32xi32>
    %38 = arith.andi %32, %37 : vector<4x32xi1>
    %39 = vector.shape_cast %38 : vector<4x32xi1> to vector<1x4x32xi1>
    %cst_16 = arith.constant 0.000000e+00 : f32
    %40 = vector.shape_cast %39 : vector<1x4x32xi1> to vector<1x4x32xi1>
    %41 = vector.broadcast %40 : vector<1x4x32xi1> to vector<8x4x32xi1>
    %42 = vector.broadcast %cst_16 : f32 to vector<8x4x32xf32>
    %43 = arith.select %41, %27, %42 : vector<8x4x32xi1>, vector<8x4x32xf32>
    %cst_17 = arith.constant dense<0.000000e+00> : vector<8x32xf32>
    %44 = vector.multi_reduction <add>, %43, %cst_17 [1] : vector<8x4x32xf32> to vector<8x32xf32>
    %45 = arith.truncf %44 : vector<8x32xf32> to vector<8x32xbf16>
    %c0_18 = arith.constant 0 : index
    %c0_19 = arith.constant 0 : index
    %46 = vector.load %arg7[%c0_18, %c0_19] : memref<32x128xbf16, #tpu.memory_space<vmem>>, vector<32x128xbf16>
    %cst_20 = arith.constant dense<0.000000e+00> : vector<8x128xf32>
    %47 = tpu.matmul %45, %46, %cst_20 {dimension_numbers = #tpu.dot_dimension_numbers<[1], [0], [0], [1], [0, 0, 1, 1], [], []>} : vector<8x32xbf16>, vector<32x128xbf16>, vector<8x128xf32> -> vector<8x128xf32>
    %c0_21 = arith.constant 0 : index
    %c0_22 = arith.constant 0 : index
    %48 = vector.load %arg8[%c0_21, %c0_22] : memref<1x128xf32, #tpu.memory_space<vmem>>, vector<1x128xf32>
    %49 = vector.broadcast %48 : vector<1x128xf32> to vector<8x128xf32>
    %50 = arith.addf %47, %49 : vector<8x128xf32>
    %c0_23 = arith.constant 0 : index
    %c0_24 = arith.constant 0 : index
    %51 = vector.load %arg9[%c0_23, %c0_24] : memref<8x128xf32, #tpu.memory_space<vmem>>, vector<8x128xf32>
    tpu.vector_store %arg9[%c0_23, %c0_24], %50 {strides = array<i32>} : memref<8x128xf32, #tpu.memory_space<vmem>>, vector<8x128xf32>,
    return
  }
  func.func @transform_0(%arg0: i32) -> (i32, i32) {
    %c0_i32 = arith.constant 0 : i32
    %c0_i32_0 = arith.constant 0 : i32
    return %arg0, %c0_i32 : i32, i32
  }
  func.func @transform_1(%arg0: i32) -> (i32, i32) {
    %c0_i32 = arith.constant 0 : i32
    %c0_i32_0 = arith.constant 0 : i32
    return %arg0, %c0_i32 : i32, i32
  }
  func.func @transform_2(%arg0: i32) -> (i32, i32) {
    %c0_i32 = arith.constant 0 : i32
    %c0_i32_0 = arith.constant 0 : i32
    %c0_i32_1 = arith.constant 0 : i32
    return %c0_i32, %c0_i32_0 : i32, i32
  }
  func.func @transform_3(%arg0: i32) -> (i32, i32) {
    %c0_i32 = arith.constant 0 : i32
    %c0_i32_0 = arith.constant 0 : i32
    %c0_i32_1 = arith.constant 0 : i32
    return %c0_i32, %c0_i32_0 : i32, i32
  }
  func.func @transform_4(%arg0: i32) -> (i32, i32) {
    %c0_i32 = arith.constant 0 : i32
    %c0_i32_0 = arith.constant 0 : i32
    %c0_i32_1 = arith.constant 0 : i32
    return %c0_i32, %c0_i32_0 : i32, i32
  }
  func.func @transform_5(%arg0: i32) -> (i32, i32) {
    %c0_i32 = arith.constant 0 : i32
    %c0_i32_0 = arith.constant 0 : i32
    %c0_i32_1 = arith.constant 0 : i32
    return %c0_i32, %c0_i32_0 : i32, i32
  }
  func.func @transform_6(%arg0: i32) -> (i32, i32) {
    %c0_i32 = arith.constant 0 : i32
    %c0_i32_0 = arith.constant 0 : i32
    %c0_i32_1 = arith.constant 0 : i32
    return %c0_i32, %c0_i32_0 : i32, i32
  }
  func.func @transform_7(%arg0: i32) -> (i32, i32) {
    %c0_i32 = arith.constant 0 : i32
    %c0_i32_0 = arith.constant 0 : i32
    %c0_i32_1 = arith.constant 0 : i32
    return %c0_i32, %c0_i32_0 : i32, i32
  }
  func.func @transform_8(%arg0: i32) -> (i32, i32) {
    %c0_i32 = arith.constant 0 : i32
    %c0_i32_0 = arith.constant 0 : i32
    return %arg0, %c0_i32 : i32, i32
  }
}

</mosaic_0001>

<bundles_post_ra>
// kernel: tpu_custom_call.1
= control target key start
LH: loop header
LB: loop body
LE: loop exit
PB: predicated region body
PF: predicated region fallthrough
CT: control target
= control target key end

     0   :  { %s3171_s0 = inlined_call_operand.hbm [shape: bf16[128,32], index: 0, kind: input, shape index: {}]   ;;  %s3172_s1 = inlined_call_operand.hbm [shape: bf16[128,32], index: 1, kind: input, shape index: {}]   ;;  %s3173_s2 = inlined_call_operand.hbm [shape: bf16[32,4], index: 2, kind: input, shape index: {}]   ;;  %s3174_s3 = inlined_call_operand.hbm [shape: f32[1,4], index: 3, kind: input, shape index: {}]   ;;  %s3175_s4 = inlined_call_operand.hbm [shape: bf16[32,32], index: 4, kind: input, shape index: {}]   ;;  %s3176_s5 = inlined_call_operand.hbm [shape: f32[1,32], index: 5, kind: input, shape index: {}]   ;;  %s3177_s6 = inlined_call_operand.hbm [shape: bf16[32,128], index: 6, kind: input, shape index: {}]   ;;  %s3178_s7 = inlined_call_operand.hbm [shape: f32[1,128], index: 7, kind: input, shape index: {}]   ;;  %s3179_s8 = inlined_call_operand.hbm [shape: f32[16,128], index: 8, kind: output, shape index: {}]  }
   0x1   :  { %3187 = sst [smem:[#allocation24_spill]] %s3173_s2 }
   0x2   :  { %3188 = sst [smem:[#allocation25_spill]] %s3174_s3 }
   0x3   :  { %3189 = sst [smem:[#allocation26_spill]] %s3175_s4 }
   0x4   :  { %3190 = sst [smem:[#allocation27_spill]] %s3176_s5 }
   0x5   :  { %3191 = sst [smem:[#allocation28_spill]] %s3177_s6 }
   0x6   :  { %13 = vsyncpa [#allocation3], 0 }
   0x7   :  { %15 = vsyncpa [#allocation3 + $0x1], 0 }
   0x8   :  { %16 = vsyncpa [#allocation6], 0 }
   0x9   :  { %18 = vsyncpa [#allocation6 + $0x1], 0 }
   0xa   :  { %19 = vsyncpa [#allocation9], 0 }
   0xb   :  { %20 = vsyncpa [#allocation12], 0 }
   0xc   :  { %21 = vsyncpa [#allocation15], 0 }
   0xd   :  { %22 = vsyncpa [#allocation4], 0 }
   0xe   :  { %24 = vsyncpa [#allocation4 + $0x1], 0  ;;  %s2587_s27 = smov 0   ;;  %s2589_s28 = smov 0  }
   0xf   :  { %s2591_s29 = smov 0   ;;  %s2593_s30 = smov 0  }
  0x10 LB: > { %s2529_s9 = smov [#allocation7]   ;;  %s2608_s11 = sadd.s32 4294967295, %s2527_s30   ;;  %s2527_s30 = sphi %s2593_s30, %s3225_s30   ;;  %s2523_s29 = sphi %s2591_s29, %s3224_s29   ;;  %s2519_s28 = sphi %s2589_s28, %s3223_s28   ;;  %s2515_s27 = sphi %s2587_s27, %s3222_s27  }
  0x11   : > { %s251_s10 = sshll.u32 %s2529_s9, 4  ;;  %p1848_p0 = scmp.ge.s32.totalorder %s2527_s30, 1  ;;  %s2613_s10 = int_to_ptr.vmem [resolvable:$true] %s251_s10 }
  0x12   : > { %p3182_p1 = scmp.eq.s32.totalorder %s2608_s11, 0  ;;  %p239_p2 = scmp.lt.s32.totalorder %s2527_s30, 3 }
  0x13   : > { %s2530_s13 = smov [#allocation8]   ;;  %s2531_s16 = smov [#allocation11]  }
  0x14   : > { %p2615_p3 = pnand %p1848_p0, %p239_p2  ;;  %s265_s14 = sshll.u32 %s2530_s13, 4  ;;  %s2628_s14 = int_to_ptr.vmem [resolvable:$true] %s265_s14 }
  0x15   : > { %s289_s17 = sshll.u32 %s2531_s16, 4  ;;  %s3194_s2 = sld [smem:[#allocation24_spill]]  ;;  %s2630_s17 = int_to_ptr.vmem [resolvable:$true] %s289_s17 }
  0x16   : > { %s3192_s12 = scalar_select %p2615_p3, 1, 0 }
  0x17   : > { %p2053_p5 = pneg %p2615_p3 }
  0x19   : > { %p2624_p6 = pnand %p2053_p5, %p3182_p1 }
  0x1b   : > { %s2213_s20 = scalar_lea.hbm %s3194_s2, 256  ;;  %p2640_p8 = pneg %p2624_p6 }
  0x1c   : > { %p2214_p7 = scmp.ne.s32.totalorder %s3194_s2, %s2213_s20  ;;  %p2220_p11 = scmp.lt.u32.totalorder %s2213_s20, %s3194_s2 }
  0x1e   : > { %p2216_p9 = pnand %p2640_p8, %p2214_p7 }
  0x20   : > { %p2217_p10 = pneg %p2216_p9 }
  0x22   : > { %p2222_p12 = pnand %p2220_p11, %p2217_p10 }
  0x24   : > { %2225 = shalt.err (!%p2222_p12)
}
  0x25   : > { %s2226_s26 = scalar_lea.vmem %s2613_s10, 256  ;;  %p2234_p5 = scmp.lt.s32.totalorder %s2613_s10, %s2613_s10 }
  0x26   : > { %p2227_p13 = scmp.ne.s32.totalorder %s2613_s10, %s2226_s26  ;;  %p2235_p4 = scmp.lt.s32.totalorder %s2226_s26, %s2226_s26 }
  0x28   : > { %p2229_p0 = pnand %p2227_p13, %p2640_p8  ;;  %p2236_p7 = por %p2235_p4, %p2234_p5 }
  0x2a   : > { %p2230_p2 = pneg %p2229_p0 }
  0x2c   : > { %p2237_p9 = pnand %p2236_p7, %p2230_p2 }
  0x2e   : > { %2240 = shalt.err (!%p2237_p9)
}
  0x2f   : > { %s3180_s9 = smov 64   ;;  %s3184_s13 = smov 4  }
  0x30   : > { %2056 = dma.hbm_to_vmem [thread:$0]  (!%p2624_p6), %s3194_s2, 256, %s2613_s10, [#allocation6], %s3180_s9, %s3180_s9, %s3184_s13  }
  0x31   : > { %s3196_s3 = sld [smem:[#allocation25_spill]] }
  0x37   : > { %s2241_s21 = scalar_lea.hbm %s3196_s3, 16 }
  0x38   : > { %p2242_p4 = scmp.ne.s32.totalorder %s3196_s3, %s2241_s21  ;;  %p2248_p12 = scmp.lt.u32.totalorder %s2241_s21, %s3196_s3 }
  0x3a   : > { %p2244_p10 = pnand %p2242_p4, %p2640_p8 }
  0x3c   : > { %p2245_p11 = pneg %p2244_p10 }
  0x3e   : > { %p2250_p13 = pnand %p2248_p12, %p2245_p11 }
  0x40   : > { %2253 = shalt.err (!%p2250_p13)
}
  0x41   : > { %s2254_s10 = scalar_lea.vmem %s2628_s14, 16  ;;  %s2261_s16 = scalar_lea.vmem %s2628_s14, 32 }
  0x42   : > { %p2255_p0 = scmp.ne.s32.totalorder %s2628_s14, %s2254_s10  ;;  %p2262_p7 = scmp.lt.s32.totalorder %s2628_s14, %s2628_s14 }
  0x43   : > { %p2263_p9 = scmp.lt.s32.totalorder %s2261_s16, %s2254_s10 }
  0x44   : > { %p2257_p2 = pnand %p2255_p0, %p2640_p8 }
  0x45   : > { %p2264_p4 = por %p2263_p9, %p2262_p7 }
  0x46   : > { %p2258_p5 = pneg %p2257_p2 }
  0x48   : > { %p2265_p10 = pnand %p2264_p4, %p2258_p5 }
  0x4a   : > { %2268 = shalt.err (!%p2265_p10)
}
  0x4b   : > { %2059 = dma.hbm_to_vmem [thread:$0]  (!%p2624_p6), %s3196_s3, 16, %s2628_s14, [#allocation9]  }
  0x4c   : > { %s3197_s5 = sld [smem:[#allocation27_spill]] }
  0x52   : > { %s2269_s22 = scalar_lea.hbm %s3197_s5, 16 }
  0x53   : > { %p2270_p11 = scmp.ne.s32.totalorder %s3197_s5, %s2269_s22  ;;  %p2276_p0 = scmp.lt.u32.totalorder %s2269_s22, %s3197_s5 }
  0x55   : > { %p2272_p12 = pnand %p2270_p11, %p2640_p8 }
  0x57   : > { %p2273_p13 = pneg %p2272_p12 }
  0x59   : > { %p2278_p2 = pnand %p2276_p0, %p2273_p13 }
  0x5b   : > { %2281 = shalt.err (!%p2278_p2)
}
  0x5c   : > { %s2282_s14 = scalar_lea.vmem %s2630_s17, 16  ;;  %s2289_s16 = scalar_lea.vmem %s2630_s17, 32 }
  0x5d   : > { %p2283_p5 = scmp.ne.s32.totalorder %s2630_s17, %s2282_s14  ;;  %p2290_p4 = scmp.lt.s32.totalorder %s2630_s17, %s2630_s17 }
  0x5e   : > { %p2291_p10 = scmp.lt.s32.totalorder %s2289_s16, %s2282_s14 }
  0x5f   : > { %p2285_p7 = pnand %p2283_p5, %p2640_p8 }
  0x60   : > { %p2292_p11 = por %p2291_p10, %p2290_p4 }
  0x61   : > { %p2286_p9 = pneg %p2285_p7 }
  0x63   : > { %p2293_p12 = pnand %p2292_p11, %p2286_p9 }
  0x65   : > { %2296 = shalt.err (!%p2293_p12)
}
  0x66   : > { %2065 = dma.hbm_to_vmem [thread:$0]  (!%p2624_p6), %s3197_s5, 16, %s2630_s17, [#allocation12]  }
  0x67   : > { %s2534_s20 = smov [#allocation10]   ;;  %s2535_s22 = smov [#allocation13]  }
  0x68   : > { %s275_s21 = sshll.u32 %s2534_s20, 4  ;;  %s299_s24 = sshll.u32 %s2535_s22, 4  ;;  %s276_s21 = int_to_ptr.vmem [resolvable:$true] %s275_s21  ;;  %s300_s24 = int_to_ptr.vmem [resolvable:$true] %s299_s24 }
  0x69   : > { %s3198_s4 = sld [smem:[#allocation26_spill]] }
  0x6f   : > { %s2297_s10 = scalar_lea.hbm %s3198_s4, 256 }
  0x70   : > { %p2298_p13 = scmp.ne.s32.totalorder %s3198_s4, %s2297_s10  ;;  %p2304_p5 = scmp.lt.u32.totalorder %s2297_s10, %s3198_s4 }
  0x72   : > { %p2300_p0 = pnand %p2298_p13, %p2640_p8 }
  0x74   : > { %p2301_p2 = pneg %p2300_p0 }
  0x76   : > { %p2306_p7 = pnand %p2304_p5, %p2301_p2 }
  0x78   : > { %2309 = shalt.err (!%p2306_p7)
}
  0x79   : > { %s2310_s17 = scalar_lea.vmem %s276_s21, 256  ;;  %p2318_p11 = scmp.lt.s32.totalorder %s276_s21, %s276_s21 }
  0x7a   : > { %p2311_p9 = scmp.ne.s32.totalorder %s276_s21, %s2310_s17  ;;  %p2319_p12 = scmp.lt.s32.totalorder %s2310_s17, %s2310_s17 }
  0x7c   : > { %p2313_p4 = pnand %p2311_p9, %p2640_p8  ;;  %p2320_p1 = por %p2319_p12, %p2318_p11 }
  0x7e   : > { %p2314_p10 = pneg %p2313_p4 }
  0x80   : > { %p2321_p3 = pnand %p2320_p1, %p2314_p10 }
  0x82   : > { %2324 = shalt.err (!%p2321_p3)
}
  0x83   : > { %s3199_s19 = smov 64   ;;  %s3200_s6 = sld [smem:[#allocation28_spill]] }
  0x84   : > { %2062 = dma.hbm_to_vmem [thread:$0]  (!%p2624_p6), %s3198_s4, 256, %s276_s21, [#allocation9], %s3199_s19, %s3199_s19, %s3184_s13  }
  0x89   : > { %s2325_s26 = scalar_lea.hbm %s3200_s6, 256 }
  0x8a   : > { %p2326_p1 = scmp.ne.s32.totalorder %s3200_s6, %s2325_s26  ;;  %p2332_p0 = scmp.lt.u32.totalorder %s2325_s26, %s3200_s6 }
  0x8c   : > { %p2328_p3 = pnand %p2326_p1, %p2640_p8 }
  0x8e   : > { %p2329_p13 = pneg %p2328_p3 }
  0x90   : > { %p2334_p2 = pnand %p2332_p0, %p2329_p13 }
  0x92   : > { %2337 = shalt.err (!%p2334_p2)
}
  0x93   : > { %s2338_s17 = scalar_lea.vmem %s300_s24, 256  ;;  %p2346_p4 = scmp.lt.s32.totalorder %s300_s24, %s300_s24 }
  0x94   : > { %p2339_p5 = scmp.ne.s32.totalorder %s300_s24, %s2338_s17  ;;  %p2347_p10 = scmp.lt.s32.totalorder %s2338_s17, %s2338_s17 }
  0x96   : > { %p2341_p7 = pnand %p2339_p5, %p2640_p8  ;;  %p2348_p11 = por %p2347_p10, %p2346_p4 }
  0x98   : > { %p2342_p9 = pneg %p2341_p7 }
  0x9a   : > { %p2349_p12 = pnand %p2348_p11, %p2342_p9 }
  0x9c   : > { %2352 = shalt.err (!%p2349_p12)
}
  0x9d   : > { %2068 = dma.hbm_to_vmem [thread:$0]  (!%p2624_p6), %s3200_s6, 256, %s300_s24, [#allocation12], %s3199_s19, %s3199_s19, %s3184_s13  }
  0x9e   : > { %s2536_s20 = smov [#allocation14]   ;;  %s2353_s10 = scalar_lea.hbm %s3178_s7, 16 }
  0x9f   : > { %s313_s22 = sshll.u32 %s2536_s20, 4  ;;  %p2354_p1 = scmp.ne.s32.totalorder %s3178_s7, %s2353_s10  ;;  %s314_s22 = int_to_ptr.vmem [resolvable:$true] %s313_s22 }
  0xa0   : > { %p2360_p0 = scmp.lt.u32.totalorder %s2353_s10, %s3178_s7 }
  0xa1   : > { %p2356_p3 = pnand %p2354_p1, %p2640_p8 }
  0xa3   : > { %p2357_p13 = pneg %p2356_p3 }
  0xa5   : > { %p2362_p2 = pnand %p2360_p0, %p2357_p13 }
  0xa7   : > { %2365 = shalt.err (!%p2362_p2)
}
  0xa8   : > { %s2366_s24 = scalar_lea.vmem %s314_s22, 16  ;;  %s2373_s21 = scalar_lea.vmem %s314_s22, 32 }
  0xa9   : > { %p2367_p5 = scmp.ne.s32.totalorder %s314_s22, %s2366_s24  ;;  %p2374_p4 = scmp.lt.s32.totalorder %s314_s22, %s314_s22 }
  0xaa   : > { %p2375_p10 = scmp.lt.s32.totalorder %s2373_s21, %s2366_s24 }
  0xab   : > { %p2369_p7 = pnand %p2367_p5, %p2640_p8 }
  0xac   : > { %p2376_p11 = por %p2375_p10, %p2374_p4 }
  0xad   : > { %p2370_p9 = pneg %p2369_p7 }
  0xaf   : > { %p2377_p12 = pnand %p2376_p11, %p2370_p9 }
  0xb1   : > { %2380 = shalt.err (!%p2377_p12)
}
  0xb2   : > { %2071 = dma.hbm_to_vmem [thread:$0]  (!%p2624_p6), %s3178_s7, 16, %s314_s22, [#allocation15]  }
  0xb3   : > { %s1847_s23 = sadd.s32 4294967294, %s2527_s30   ;;  %s2774_s15 = sadd.s32 1, %s2527_s30  }
  0xb4   : > { %s34_s25 = ssub.s32 %s2527_s30, %s2774_s15  ;;  %s37_s26 = sadd.s32 1, %s2523_s29 }
  0xb5   : > { %p35_p8 = scmp.eq.s32.totalorder %s34_s25, 0  ;;  %p44_p1 = scmp.ne.s32.totalorder %s2523_s29, %s2519_s28 }
  0xb6   : > { %p45_p3 = scmp.eq.s32.totalorder %s2527_s30, 0  ;;  %p50_p13 = scmp.ne.s32.totalorder %s2519_s28, %s2515_s27 }
  0xb7   : > { %s2785_s10 = scalar_select %p35_p8, %s2523_s29, %s37_s26  }
  0xb8   : > { %p2787_p0 = por %p45_p3, %p44_p1  ;;  %p3202_p2 = scmp.eq.s32.totalorder %s2608_s11, 0 }
  0xb9   : > { %p226_p5 = scmp.eq.s32.totalorder %s2608_s11, 1  ;;  %p232_p7 = scmp.eq.s32.totalorder %s1847_s23, 1 }
  0xba   : > { %p2793_p6 = por %p3202_p2, %p50_p13  ;;  %p2089_p9 = scmp.lt.s32.totalorder %s2527_s30, 2 }
  0xbb   : > { %s324_s16 = sand.u32 1, %s2523_s29   ;;  %p2800_p4 = por %p226_p5, %p44_p1 }
  0xbc   : > { %p2804_p10 = por %p232_p7, %p50_p13  ;;  %s1856_s24 = sshll.u32 %s324_s16, 5 }
  0xbd   : > { %s3204_s18 = scalar_select %p2800_p4, 1, 0 }
  0xbe   : > { %s3205_s17 = scalar_select %p2804_p10, 1, 0 }
  0xbf   : > { %s1910_s21 = sshll.u32 %s2527_s30, 9  ;;  %s328_s23 = scalar_lea.vmem [#allocation2], %s1856_s24 }
  0xc0   : > { %s2812_s25 = scalar_lea.hbm %s3171_s0, %s1910_s21  ;;  %s335_s26 = sshll.u32 %s328_s23, 4  ;;  %s2814_s26 = int_to_ptr.vmem [resolvable:$true] %s335_s26 }
  0xc1   : > { %p2818_p11 = pnand %p2089_p9, %p2787_p0  ;;  %s2825_s9 = scalar_lea.hbm %s3172_s1, %s1910_s21 }
  0xc2   : > { %s349_s20 = scalar_lea.vmem [#allocation5], %s1856_s24  ;;  %s2829_s5 = scalar_lea.sflag [#allocation3], %s324_s16 }
  0xc3   : > { %s2827_s4 = sshll.u32 %s349_s20, 4  ;;  %s2381_s23 = scalar_lea.hbm %s2812_s25, 512  ;;  %s2861_s4 = int_to_ptr.vmem [resolvable:$true] %s2827_s4 }
  0xc4   : > { %p2382_p12 = scmp.ne.s32.totalorder %s2812_s25, %s2381_s23  ;;  %p2383_p8 = pneg %p2818_p11 }
  0xc5   : > { %s2386_s2 = scalar_lea.hbm %s3171_s0, 1024  ;;  %p2387_p13 = scmp.lt.u32.totalorder %s2812_s25, %s3171_s0 }
  0xc6   : > { %p2384_p1 = pnand %p2383_p8, %p2382_p12  ;;  %p2388_p0 = scmp.lt.u32.totalorder %s2386_s2, %s2381_s23 }
  0xc7   : > { %p2390_p5 = scmp.lt.u32.totalorder %s2381_s23, %s2812_s25 }
  0xc8   : > { %p2385_p3 = pneg %p2384_p1  ;;  %p2389_p2 = por %p2388_p0, %p2387_p13 }
  0xca   : > { %p2391_p7 = por %p2390_p5, %p2389_p2 }
  0xcc   : > { %p2392_p9 = pnand %p2391_p7, %p2385_p3 }
  0xce   : > { %2395 = shalt.err (!%p2392_p9)
}
  0xcf   : > { %s2396_s16 = scalar_lea.vmem %s2814_s26, 512  ;;  %s2537_s6 = smov [#allocation2]  }
  0xd0   : > { %p2397_p12 = scmp.ne.s32.totalorder %s2814_s26, %s2396_s16  ;;  %s2401_s24 = sshll.u32 %s2537_s6, 4  ;;  %s2402_s24 = int_to_ptr.vmem [resolvable:$false] %s2401_s24 }
  0xd1   : > { %s2403_s20 = scalar_lea.vmem %s2402_s24, 1024  ;;  %p2404_p4 = scmp.lt.s32.totalorder %s2814_s26, %s2402_s24 }
  0xd2   : > { %p2399_p1 = pnand %p2397_p12, %p2383_p8  ;;  %p2405_p13 = scmp.lt.s32.totalorder %s2403_s20, %s2396_s16 }
  0xd4   : > { %p2400_p10 = pneg %p2399_p1  ;;  %p2406_p0 = por %p2405_p13, %p2404_p4 }
  0xd6   : > { %p2407_p2 = pnand %p2406_p0, %p2400_p10 }
  0xd8   : > { %2410 = shalt.err (!%p2407_p2)
}
  0xd9   : > { %s3207_s23 = smov 4   ;;  %s345_s14 = sand.u32 1, %s2527_s30  }
  0xda   : > { %2075 = dma.hbm_to_vmem [thread:$0]  (!%p2818_p11), %s2812_s25, 512, %s2814_s26, %s2829_s5, %s3199_s19, %s3199_s19, %s3207_s23  }
  0xdb   : > { %s2864_s2 = scalar_lea.sflag [#allocation6], %s345_s14  ;;  %s2411_s3 = scalar_lea.hbm %s2825_s9, 512 }
  0xdc   : > { %p2412_p4 = scmp.ne.s32.totalorder %s2825_s9, %s2411_s3  ;;  %s2416_s6 = scalar_lea.hbm %s3172_s1, 1024 }
  0xdd   : > { %p2417_p5 = scmp.lt.u32.totalorder %s2825_s9, %s3172_s1  ;;  %p2418_p7 = scmp.lt.u32.totalorder %s2416_s6, %s2411_s3 }
  0xde   : > { %p2414_p10 = pnand %p2412_p4, %p2383_p8  ;;  %p2420_p12 = scmp.lt.u32.totalorder %s2411_s3, %s2825_s9 }
  0xdf   : > { %p2419_p9 = por %p2418_p7, %p2417_p5 }
  0xe0   : > { %p2415_p3 = pneg %p2414_p10 }
  0xe1   : > { %p2421_p1 = por %p2420_p12, %p2419_p9 }
  0xe3   : > { %p2422_p13 = pnand %p2421_p1, %p2415_p3 }
  0xe5   : > { %2425 = shalt.err (!%p2422_p13)
}
  0xe6   : > { %s2426_s5 = scalar_lea.vmem %s2861_s4, 512  ;;  %s2538_s25 = smov [#allocation5]  }
  0xe7   : > { %p2427_p0 = scmp.ne.s32.totalorder %s2861_s4, %s2426_s5  ;;  %s2431_s26 = sshll.u32 %s2538_s25, 4  ;;  %s2432_s26 = int_to_ptr.vmem [resolvable:$false] %s2431_s26 }
  0xe8   : > { %s2433_s14 = scalar_lea.vmem %s2432_s26, 1024  ;;  %p2434_p10 = scmp.lt.s32.totalorder %s2861_s4, %s2432_s26 }
  0xe9   : > { %p2429_p2 = pnand %p2427_p0, %p2383_p8  ;;  %p2435_p5 = scmp.lt.s32.totalorder %s2433_s14, %s2426_s5 }
  0xeb   : > { %p2430_p4 = pneg %p2429_p2  ;;  %p2436_p7 = por %p2435_p5, %p2434_p10 }
  0xed   : > { %p2437_p9 = pnand %p2436_p7, %p2430_p4 }
  0xef   : > { %2440 = shalt.err (!%p2437_p9)
}
  0xf0   : > { %2078 = dma.hbm_to_vmem [thread:$0]  (!%p2818_p11), %s2825_s9, 512, %s2861_s4, %s2864_s2, %s3199_s19, %s3199_s19, %s3207_s23  }
  0xf1   : > { %p3208_p8 = scmp.ne.s32.totalorder %s3192_s12, 0 }
  0xf2   : > { %s2896_s3 = sand.u32 (!%p3208_p8), 1, %s2519_s28  }
  0xf3   : > { %368 = sbr.rel (%p3208_p8) target bundleno = 1168 (0x490), region = 52  ;;  %s1863_s21 = sshll.u32 (!%p3208_p8), %s2896_s3, 5 }
  0xf4   : > { %s371_s16 = scalar_lea.sflag (!%p3208_p8), [#allocation3], %s2896_s3  ;;  %s2900_s6 = scalar_lea.vmem (!%p3208_p8), [#allocation2], %s1863_s21 }
  0xfa   : > { %2486 = dma.done.wait (%p2793_p6), %s371_s16, 512  }
  0xfb   : > { %2488 = vsyncadd (%p2793_p6), %s371_s16, 4294966784  ;;  %s379_s4 = sand.u32 1, %s2608_s11   ;;  %s2907_s13 = scalar_lea.vmem [#allocation5], %s1863_s21 }
  0xfc   : > { %s380_s12 = scalar_lea.sflag [#allocation6], %s379_s4 }
  0xfd   : > { %2490 = dma.done.wait (%p2793_p6), %s380_s12, 512  }
  0xfe   : > { %2492 = vsyncadd (%p2793_p6), %s380_s12, 4294966784  ;;  %p3209_p11 = scmp.eq.s32.totalorder %s2608_s11, 0 }
 0x100   : > { %2494 = dma.done.wait (%p3209_p11), [#allocation6], 256   ;;  %p3210_p3 = pmov %p3209_p11 }
 0x102   : > { %2496 = vsyncadd (%p3210_p3), [#allocation6], 4294967040  ;;  %p3211_p12 = pmov %p3210_p3 }
 0x103   : > { %p3212_p1 = pmov %p3210_p3 }
 0x104   : > { %2498 = dma.done.wait (%p3211_p12), [#allocation9], 272  }
 0x105   : > { %2500 = vsyncadd (%p3212_p1), [#allocation9], 4294967024  ;;  %p3213_p13 = pmov %p3212_p1 }
 0x106   : > { %p3214_p0 = pmov %p3212_p1 }
 0x107   : > { %2502 = dma.done.wait (%p3213_p13), [#allocation12], 272  }
 0x108   : > { %2504 = vsyncadd (%p3214_p0), [#allocation12], 4294967024  ;;  %p3215_p6 = pmov %p3214_p0 }
 0x109   : > { %p3216_p2 = pmov %p3214_p0 }
 0x10a   : > { %2506 = dma.done.wait (%p3215_p6), [#allocation15], 16  }
 0x10b   : > { %2508 = vsyncadd (%p3216_p2), [#allocation15], 4294967280  ;;  %v2167_v0 = vld [vmem:[#allocation7] sm:$0xff]   ;;  %v2168_v1 = vld [vmem:[#allocation7 + $0x8] sm:$0xff]   ;;  %vm507_vm0 = vcmask 261120   ;;  %v2539_v12 = vmov 0.0  }
 0x10c   : > { %1943 = vmatprep.subr.bf16.mxu0 %v2167_v0  ;;  %v2169_v2 = vld [vmem:[%s2900_s6] sm:$0xff]   ;;  %v2170_v3 = vld [vmem:[%s2900_s6 + $0x8] sm:$0xff]   ;;  %v2171_v4 = vld [vmem:[%s2900_s6 + $0x10] sm:$0xff]   ;;  %vm705_vm1 = vcmask 31744   ;;  %vm1134_vm2 = vcmask 1043456   ;;  %vm2540_vm3 = vmmov 0  }
 0x10d   : > { %1944 = vmatpush3.bf16.msra.mxu0 %v2167_v0  ;;  %1947 = vmatprep.mubr.msk.bf16.mxu0 %vm507_vm0, %v2169_v2  ;;  %v2173_v5 = vld [vmem:[#allocation10] sm:$0xff]   ;;  %v2174_v6 = vld [vmem:[#allocation10 + $0x8] sm:$0xff]   ;;  %v2176_v8 = vld [vmem:[%s2907_s13 + $0x8] sm:$0xff]   ;;  %vm1130_vm4 = vcmask 64512   ;;  %vm1520_vm8 = vcmask 257024   ;;  %vm1612_vm9 = vcmask 1041409  }
 0x10e   : > { %1945 = vmatprep.subr.bf16.mxu0 %v2168_v1  ;;  %1955 = vmatprep.subr.bf16.mxu1 %v2173_v5  ;;  %v2175_v7 = vld [vmem:[%s2907_s13] sm:$0xff]   ;;  %v2177_v9 = vld [vmem:[%s2907_s13 + $0x10] sm:$0xff]   ;;  %v2172_v10 = vld [vmem:[%s2900_s6 + $0x18] sm:$0xff]   ;;  %vm1614_vm10 = vcmask 1042434   ;;  %vm1616_vm11 = vcmask 1043459   ;;  %vm1618_vm12 = vcmask 1044484  }
 0x10f   : > { %1956 = vmatpush3.bf16.msra.mxu1 %v2173_v5  ;;  %1959 = vmatprep.mubr.msk.bf16.mxu1 %vm507_vm0, %v2175_v7  ;;  %v2178_v11 = vld [vmem:[%s2907_s13 + $0x18] sm:$0xff]   ;;  %v1872_v13 = vld [vmem:[#allocation8] ss:$0 sm:$0xff]  ;;  %v2959_v25 = vld [vmem:[#allocation11] ss:$0 sm:$0xff]  ;;  %vm1620_vm13 = vcmask 1045509  }
 0x110   : > { %1957 = vmatprep.subr.bf16.mxu1 %v2174_v6  ;;  %vm1622_vm14 = vcmask 1046534   ;;  %vm1624_vm15 = vcmask 1047559   ;;  %s1871_s19 = sshll.u32 %s2896_s3, 3  ;;  %s1907_s22 = sshll.u32 %s2608_s11, 7 }
 0x111   : > { %1946 = vmatpush3.bf16.msra.mxu0 %v2168_v1  ;;  %s444_s9 = scalar_lea.vmem [#allocation16], %s1871_s19  ;;  %s3127_s20 = scalar_lea.hbm %s3179_s8, %s1907_s22 }
 0x112   : > { %1967 = vmatprep.subr.bf16.mxu0 %v2539_v12  ;;  %s1697_s23 = sshll.u32 %s444_s9, 4  ;;  %s1684_s5 = scalar_lea.sflag [#allocation4], %s2896_s3  ;;  %s3129_s23 = int_to_ptr.vmem [resolvable:$true] %s1697_s23 }
 0x113   : > { %1958 = vmatpush3.bf16.msra.mxu1 %v2174_v6  ;;  %s2441_s11 = scalar_lea.vmem %s3129_s23, 128  ;;  %p3219_p10 = scmp.ne.s32.totalorder %s3204_s18, 0 }
 0x114   : > { %1948 = vmatmul.mubr.msk.bf16.vlgmr.msra.gmra.mrb[0].mxu0 %vm507_vm0, %v2170_v3  ;;  %1973 = vmatprep.subr.bf16.mxu1 %v2539_v12  ;;  %p2442_p4 = scmp.ne.s32.totalorder %s3129_s23, %s2441_s11  ;;  %s2541_s25 = smov [#allocation16]  }
 0x115   : > { %1951 = vmatprep.mubr.msk.bf16.mxu0 %vm507_vm0, %v2171_v4  ;;  %s2445_s26 = sshll.u32 %s2541_s25, 4  ;;  %s2446_s26 = int_to_ptr.vmem [resolvable:$false] %s2445_s26 }
 0x116   : > { %1960 = vmatmul.mubr.msk.bf16.vlgmr.msra.gmra.mrb[0].mxu1 %vm507_vm0, %v2176_v8  ;;  %p2443_p5 = pnand %p2442_p4, %p3219_p10  ;;  %s2447_s14 = scalar_lea.vmem %s2446_s26, 256 }
 0x117   : > { %1963 = vmatprep.mubr.msk.bf16.mxu1 %vm507_vm0, %v2177_v9  ;;  %p2448_p9 = scmp.lt.s32.totalorder %s3129_s23, %s2446_s26  ;;  %p2449_p8 = scmp.lt.s32.totalorder %s2447_s14, %s2441_s11 }
 0x118   : > { %p2444_p7 = pneg %p2443_p5 }
 0x119   : > { %p2450_p11 = por %p2449_p8, %p2448_p9 }
 0x11b   : > { %p2451_p3 = pnand %p2450_p11, %p2444_p7 }
 0x11c   : > { %1952 = vmatmul.mubr.msk.bf16.gmra.mrb[4].mxu0 %vm507_vm0, %v2172_v10 }
 0x11d   : > { %1969 = vmatprep.mubr.msk.bf16.mxu0 %vm2540_vm3, %v2539_v12 }
 0x11e   : > { %1964 = vmatmul.mubr.msk.bf16.gmra.mrb[4].mxu1 %vm507_vm0, %v2178_v11 }
 0x11f   : > { %1975 = vmatprep.mubr.msk.bf16.mxu1 %vm2540_vm3, %v2539_v12 }
 0x1e7   : > { %v1949_v14 = vpop.f32.mrb[0].mxu0 }
 0x1e8   : > { %v2947_v15 = vadd.f32 %v1949_v14, %v1872_v13  ;;  %v554_v16 = vpop.f32.mrb[1].mxu0 }
 0x1e9   : > { %v2949_v17 = vadd.f32 %v1872_v13, %v554_v16  ;;  %v1950_v18 = vpop.f32.mrb[2].mxu0  ;;  %v1961_v31 = vpop.f32.mrb[0].mxu1 }
 0x1ea   : > { %v720_v19 = vsel %vm705_vm1, %v2947_v15, -inf  ;;  %v2953_v20 = vadd.f32 %v1950_v18, %v1872_v13  ;;  %v557_v21 = vpop.f32.mrb[3].mxu0  ;;  %v2966_v34 = vadd.f32 %v1961_v31, %v2959_v25  ;;  %v674_v35 = vpop.f32.mrb[1].mxu1 }
 0x1eb   : > { %v721_v22 = vrot.slane %v720_v19, 4  ;;  %v706_v23 = vsel %vm705_vm1, %v2949_v17, -inf  ;;  %v2957_v24 = vadd.f32 %v1872_v13, %v557_v21  ;;  %v2969_v39 = vadd.f32 %v2959_v25, %v674_v35  ;;  %v2971_v40 = vpop.f32.mrb[2].mxu1 }
 0x1ec   : > { %v707_v26 = vrot.slane %v706_v23, 4  ;;  %v727_v27 = vsel %vm705_vm1, %v2953_v20, -inf  ;;  %v1124_v45 = vpack.c.bf16 %v2966_v34, %v2966_v34  ;;  %v2977_v46 = vpop.f32.mrb[3].mxu1 }
 0x1ed   : > { %v722_v28 = vmax.f32 %v720_v19, %v721_v22  ;;  %v728_v29 = vrot.slane %v727_v27, 4  ;;  %v713_v30 = vsel %vm705_vm1, %v2957_v24, -inf  ;;  %v1122_v51 = vpack.c.bf16 %v2969_v39, %v2969_v39 }
 0x1ee   : > { %v708_v32 = vmax.f32 %v706_v23, %v707_v26  ;;  %v714_v33 = vrot.slane %v713_v30, 4 }
 0x1ef   : > { %v723_v36 = vrot.slane %v722_v28, 2  ;;  %v729_v37 = vmax.f32 %v727_v27, %v728_v29  ;;  %v1953_v38 = vpop.f32.mrb[4].mxu0 }
 0x1f0   : > { %v709_v41 = vrot.slane %v708_v32, 2  ;;  %v715_v42 = vmax.f32 %v713_v30, %v714_v33  ;;  %v2973_v43 = vadd.f32 %v1953_v38, %v1872_v13  ;;  %v570_v44 = vpop.f32.mrb[5].mxu0 }
 0x1f1   : > { %v724_v47 = vmax.f32 %v722_v28, %v723_v36  ;;  %v730_v48 = vrot.slane %v729_v37, 2  ;;  %v2979_v49 = vadd.f32 %v1872_v13, %v570_v44  ;;  %v1954_v50 = vpop.f32.mrb[6].mxu0  ;;  %v678_v44 = vadd.f32 %v2959_v25, %v2977_v46 }
 0x1f2   : > { %v710_v52 = vmax.f32 %v708_v32, %v709_v41  ;;  %v716_v53 = vrot.slane %v715_v42, 2  ;;  %v748_v54 = vsel %vm705_vm1, %v2973_v43, -inf  ;;  %v2985_v55 = vadd.f32 %v1954_v50, %v1872_v13  ;;  %v573_v56 = vpop.f32.mrb[7].mxu0 }
 0x1f3   : > { %v725_v57 = vrot.slane %v724_v47, 1  ;;  %v731_v58 = vmax.f32 %v729_v37, %v730_v48  ;;  %v749_v59 = vrot.slane %v748_v54, 4  ;;  %v734_v60 = vsel %vm705_vm1, %v2979_v49, -inf }
 0x1f4   : > { %v711_v61 = vrot.slane %v710_v52, 1  ;;  %v717_v62 = vmax.f32 %v715_v42, %v716_v53  ;;  %v735_v63 = vrot.slane %v734_v60, 4  ;;  %v755_v0 = vsel %vm705_vm1, %v2985_v55, -inf }
 0x1f5   : > { %v726_v1 = vmax.f32 %v724_v47, %v725_v57  ;;  %v732_v2 = vrot.slane %v731_v58, 1  ;;  %v750_v3 = vmax.f32 %v748_v54, %v749_v59  ;;  %v756_v4 = vrot.slane %v755_v0, 4 }
 0x1f6   : > { %v712_v5 = vmax.f32 %v710_v52, %v711_v61  ;;  %v718_v6 = vrot.slane %v717_v62, 1  ;;  %v736_v7 = vmax.f32 %v734_v60, %v735_v63  ;;  %v2991_v8 = vadd.f32 %v1872_v13, %v573_v56 }
 0x1f7   : > { %v764_v9 = vsub.f32 %v2947_v15, %v726_v1  ;;  %v733_v10 = vmax.f32 %v731_v58, %v732_v2  ;;  %v751_v11 = vrot.slane %v750_v3, 2  ;;  %v757_v14 = vmax.f32 %v755_v0, %v756_v4 }
 0x1f8   : > { %v762_v16 = vsub.f32 %v2949_v17, %v712_v5  ;;  %v719_v18 = vmax.f32 %v717_v62, %v718_v6  ;;  %v737_v19 = vrot.slane %v736_v7, 2  ;;  %v741_v21 = vsel %vm705_vm1, %v2991_v8, -inf }
 0x1f9   : > { %v774_v22 = vmul.f32 1.442695, %v764_v9  ;;  %v765_v23 = vsub.f32 %v2953_v20, %v733_v10  ;;  %v752_v26 = vmax.f32 %v750_v3, %v751_v11  ;;  %v758_v27 = vrot.slane %v757_v14, 2 }
 0x1fa   : > { %v770_v28 = vmul.f32 1.442695, %v762_v16  ;;  %v763_v13 = vsub.f32 %v2957_v24, %v719_v18  ;;  %v738_v29 = vmax.f32 %v736_v7, %v737_v19  ;;  %v742_v15 = vrot.slane %v741_v21, 4 }
 0x1fb   : > { %2181 = vpow2.f32 %v774_v22  ;;  %v776_v30 = vmul.f32 1.442695, %v765_v23  ;;  %v753_v31 = vrot.slane %v752_v26, 1  ;;  %v759_v32 = vmax.f32 %v757_v14, %v758_v27 }
 0x1fc   : > { %2183 = vpow2.f32 %v770_v28  ;;  %v772_v17 = vmul.f32 1.442695, %v763_v13  ;;  %v739_v33 = vrot.slane %v738_v29, 1  ;;  %v743_v34 = vmax.f32 %v741_v21, %v742_v15 }
 0x1fd   : > { %2185 = vpow2.f32 %v776_v30  ;;  %v754_v35 = vmax.f32 %v752_v26, %v753_v31  ;;  %v760_v36 = vrot.slane %v759_v32, 1  ;;  %v3000_v20 = vsel %vm1134_vm2, %v1124_v45, 0 }
 0x1fe   : > { %2187 = vpow2.f32 %v772_v17  ;;  %v740_v37 = vmax.f32 %v738_v29, %v739_v33  ;;  %v744_v38 = vrot.slane %v743_v34, 2  ;;  %v1136_v24 = vsel %vm1134_vm2, %v1122_v51, 0 }
 0x1ff   : > { %v768_v39 = vsub.f32 %v2973_v43, %v754_v35  ;;  %v761_v41 = vmax.f32 %v759_v32, %v760_v36  ;;  %v686_v42 = vadd.f32 %v2971_v40, %v2959_v25  ;;  %1968 = vmatpush3.bf16.msra.mxu0 %v1136_v24  ;;  %v1123_v51 = vpack.c.bf16 %v678_v44, %v678_v44 }
 0x200   : > { %v766_v47 = vsub.f32 %v2979_v49, %v740_v37  ;;  %v745_v48 = vmax.f32 %v743_v34, %v744_v38  ;;  %1979 = vmatprep.subr.bf16.mxu0 %v2539_v12 }
 0x201   : > { %v782_v45 = vmul.f32 1.442695, %v768_v39  ;;  %v769_v50 = vsub.f32 %v2985_v55, %v761_v41  ;;  %v1125_v52 = vpack.c.bf16 %v686_v42, %v686_v42  ;;  %v1182_v46 = vsel %vm1134_vm2, %v1123_v51, 0 }
 0x202   : > { %v778_v53 = vmul.f32 1.442695, %v766_v47  ;;  %v746_v43 = vrot.slane %v745_v48, 1  ;;  %1974 = vmatpush3.bf16.msra.mxu1 %v1182_v46 }
 0x203   : > { %2189 = vpow2.f32 %v782_v45  ;;  %v784_v54 = vmul.f32 1.442695, %v769_v50  ;;  %v3012_v40 = vsel %vm1134_vm2, %v1125_v52, 0  ;;  %1985 = vmatprep.subr.bf16.mxu1 %v2539_v12 }
 0x204   : > { %2191 = vpow2.f32 %v778_v53  ;;  %v747_v56 = vmax.f32 %v745_v48, %v746_v43 }
 0x205   : > { %v3015_v49 = vpop.eup %2181  ;;  %2193 = vpow2.f32 %v784_v54 }
 0x206   : > { %v3018_v55 = vpop.eup %2183  ;;  %v800_v57 = vsel %vm705_vm1, %v3015_v49, 0.0  ;;  %v767_v58 = vsub.f32 %v2991_v8, %v747_v56 }
 0x207   : > { %v3023_v59 = vpop.eup %2185  ;;  %v801_v60 = vrot.slane %v800_v57, 4  ;;  %v786_v61 = vsel %vm705_vm1, %v3018_v55, 0.0 }
 0x208   : > { %v3027_v62 = vpop.eup %2187  ;;  %v787_v63 = vrot.slane %v786_v61, 4  ;;  %v807_v0 = vsel %vm705_vm1, %v3023_v59, 0.0  ;;  %v780_v1 = vmul.f32 1.442695, %v767_v58 }
 0x209   : > { %v802_v2 = vadd.f32 %v801_v60, %v800_v57  ;;  %v808_v3 = vrot.slane %v807_v0, 4  ;;  %v793_v4 = vsel %vm705_vm1, %v3027_v62, 0.0 }
 0x20a   : > { %v788_v5 = vadd.f32 %v787_v63, %v786_v61  ;;  %v794_v6 = vrot.slane %v793_v4, 4  ;;  %2195 = vpow2.f32 %v780_v1 }
 0x20b   : > { %v803_v7 = vrot.slane %v802_v2, 2  ;;  %v809_v8 = vadd.f32 %v808_v3, %v807_v0 }
 0x20c   : > { %v795_v9 = vadd.f32 %v794_v6, %v793_v4  ;;  %v789_v10 = vrot.slane %v788_v5, 2 }
 0x20d   : > { %v3033_v11 = vpop.eup %2189  ;;  %v810_v14 = vrot.slane %v809_v8, 2  ;;  %v804_v16 = vadd.f32 %v803_v7, %v802_v2 }
 0x20e   : > { %v3035_v18 = vpop.eup %2191  ;;  %v828_v19 = vsel %vm705_vm1, %v3033_v11, 0.0  ;;  %v790_v21 = vadd.f32 %v789_v10, %v788_v5  ;;  %v796_v22 = vrot.slane %v795_v9, 2 }
 0x20f   : > { %v2194_v23 = vpop.eup %2193  ;;  %v829_v26 = vrot.slane %v828_v19, 4  ;;  %v814_v27 = vsel %vm705_vm1, %v3035_v18, 0.0  ;;  %v805_v28 = vrot.slane %v804_v16, 1  ;;  %v811_v13 = vadd.f32 %v810_v14, %v809_v8 }
 0x210   : > { %v815_v29 = vrot.slane %v814_v27, 4  ;;  %v835_v15 = vsel %vm705_vm1, %v2194_v23, 0.0  ;;  %v791_v30 = vrot.slane %v790_v21, 1  ;;  %v797_v31 = vadd.f32 %v796_v22, %v795_v9  ;;  %v1965_v22 = vpop.f32.mrb[4].mxu1 }
 0x211   : > { %v830_v32 = vadd.f32 %v829_v26, %v828_v19  ;;  %v836_v17 = vrot.slane %v835_v15, 4  ;;  %v806_v33 = vadd.f32 %v805_v28, %v804_v16  ;;  %v812_v34 = vrot.slane %v811_v13, 1 }
 0x212   : > { %v816_v35 = vadd.f32 %v815_v29, %v814_v27  ;;  %v792_v36 = vadd.f32 %v791_v30, %v790_v21  ;;  %v798_v37 = vrot.slane %v797_v31, 1 }
 0x213   : > { %v831_v38 = vrot.slane %v830_v32, 2  ;;  %v837_v24 = vadd.f32 %v836_v17, %v835_v15  ;;  %v813_v39 = vadd.f32 %v812_v34, %v811_v13  ;;  %2197 = vrcp.f32 %v806_v33 }
 0x214   : > { %v2196_v41 = vpop.eup %2195  ;;  %v799_v42 = vadd.f32 %v798_v37, %v797_v31  ;;  %2199 = vrcp.f32 %v792_v36  ;;  %v817_v44 = vrot.slane %v816_v35, 2 }
 0x215   : > { %v838_v47 = vrot.slane %v837_v24, 2  ;;  %v821_v48 = vsel %vm705_vm1, %v2196_v41, 0.0  ;;  %2201 = vrcp.f32 %v813_v39  ;;  %v832_v45 = vadd.f32 %v831_v38, %v830_v32 }
 0x216   : > { %v822_v50 = vrot.slane %v821_v48, 4  ;;  %2203 = vrcp.f32 %v799_v42  ;;  %v818_v52 = vadd.f32 %v817_v44, %v816_v35 }
 0x217   : > { %v833_v51 = vrot.slane %v832_v45, 1  ;;  %v839_v53 = vadd.f32 %v838_v47, %v837_v24 }
 0x218   : > { %v823_v43 = vadd.f32 %v822_v50, %v821_v48  ;;  %v819_v54 = vrot.slane %v818_v52, 1 }
 0x219   : > { %v834_v46 = vadd.f32 %v833_v51, %v832_v45  ;;  %v840_v56 = vrot.slane %v839_v53, 1 }
 0x21a   : > { %v824_v57 = vrot.slane %v823_v43, 2  ;;  %v820_v60 = vadd.f32 %v819_v54, %v818_v52 }
 0x21b   : > { %v841_v58 = vadd.f32 %v840_v56, %v839_v53  ;;  %2205 = vrcp.f32 %v834_v46  ;;  %v2179_v56 = vld [vmem:[#allocation13] sm:$0xff]  }
 0x21c   : > { %v825_v61 = vadd.f32 %v824_v57, %v823_v43  ;;  %v2180_v57 = vld [vmem:[#allocation13 + $0x8] sm:$0xff]  }
 0x21d   : > { %v2198_v63 = vpop.eup %2197  ;;  %2207 = vrcp.f32 %v841_v58  ;;  %v1500_v58 = vlaneseq }
 0x21e   : > { %v2200_v0 = vpop.eup %2199  ;;  %v826_v1 = vrot.slane %v825_v61, 1  ;;  %v852_v4 = vmul.f32 %v2198_v63, %v3015_v49  ;;  %2209 = vrcp.f32 %v820_v60  ;;  %v699_v49 = vadd.f32 %v1965_v22, %v2959_v25 }
 0x21f   : > { %v2202_v2 = vpop.eup %2201  ;;  %v850_v7 = vmul.f32 %v2200_v0, %v3018_v55  ;;  %v1503_v60 = vshrl.u32 %v1500_v58, 7  ;;  %v1501_v63 = vand.u32 127, %v1500_v58 }
 0x220   : > { %v2204_v3 = vpop.eup %2203  ;;  %v853_v5 = vmul.f32 %v2202_v2, %v3023_v59  ;;  %v827_v6 = vadd.f32 %v826_v1, %v825_v61  ;;  %v690_v59 = vpop.f32.mrb[5].mxu1  ;;  %v1128_v28 = vpack.c.bf16 %v699_v49, %v699_v49 }
 0x221   : > { %v851_v8 = vmul.f32 %v2204_v3, %v3027_v62  ;;  %v691_v26 = vadd.f32 %v2959_v25, %v690_v59  ;;  %v1966_v27 = vpop.f32.mrb[6].mxu1  ;;  %v1506_v61 = vadd.s32 1, %v1503_v60  ;;  %v1504_v0 = vmul.u32 8, %v1503_v60 }
 0x222   : > { %v2146_v9 = vpack.i.bf16 %v853_v5, %v852_v4  ;;  %2211 = vrcp.f32 %v827_v6  ;;  %v1412_v32 = vsel %vm1134_vm2, %v1128_v28, 0 }
 0x223   : > { %v2139_v10 = vpack.i.bf16 %v851_v8, %v850_v7  ;;  %v1126_v29 = vpack.c.bf16 %v691_v26, %v691_v26  ;;  %v1507_v1 = vmul.u32 8, %v1506_v61  ;;  %vm1505_vm5 = vcmp.ge.s32.totalorder %v1501_v63, %v1504_v0 }
 0x225   : > { %v2206_v14 = vpop.eup %2205  ;;  %2140 = vxpose.xlu0.b32.start.end [1/1] (short) (narrow) %v2139_v10, 8  ;;  %v1320_v33 = vsel %vm1134_vm2, %v1126_v29, 0  ;;  %vm1508_vm6 = vcmp.lt.s32.totalorder %v1501_v63, %v1507_v1 }
 0x226   : > { %v856_v19 = vmul.f32 %v2206_v14, %v3033_v11  ;;  %v702_v11 = vadd.f32 %v1966_v27, %v2959_v25  ;;  %vm3091_vm7 = vmand %vm1505_vm5, %vm1508_vm6 }
 0x227   : > { %v2208_v16 = vpop.eup %2207 }
 0x228   : > { %v857_v21 = vmul.f32 %v2208_v16, %v2194_v23  ;;  %v2210_v55 = vpop.eup %2209  ;;  %v693_v23 = vpop.f32.mrb[7].mxu1  ;;  %v1129_v17 = vpack.c.bf16 %v702_v11, %v702_v11 }
 0x229   : > { %2147 = vxpose.xlu0.b32.start.end [1/1] (short) (narrow) %v2146_v9, 8  ;;  %v694_v15 = vadd.f32 %v2959_v25, %v693_v23  ;;  %v854_v30 = vmul.f32 %v2210_v55, %v3035_v18 }
 0x22a   : > { %v2160_v62 = vpack.i.bf16 %v857_v21, %v856_v19  ;;  %v1458_v36 = vsel %vm1134_vm2, %v1129_v17, 0 }
 0x22b   : > { %v1127_v34 = vpack.c.bf16 %v694_v15, %v694_v15 }
 0x22c   : > { %v2212_v13 = vpop.eup %2211 }
 0x22d   : > { %v855_v31 = vmul.f32 %v2212_v13, %v2196_v41  ;;  %v1366_v37 = vsel %vm1134_vm2, %v1127_v34, 0 }
 0x22f   : > { %v2153_v35 = vpack.i.bf16 %v855_v31, %v854_v30 }
 0x231   : > { %2154 = vxpose.xlu1.b32.start.end [1/1] (short) (narrow) %v2153_v35, 8 }
 0x235   : > { %2161 = vxpose.xlu1.b32.start.end [1/1] (short) (narrow) %v2160_v62, 8 }
 0x2a5   : > { %v2141_v38 = vpop.trf.xlu0 }
 0x2a6   : > { %v2145_v24 = vunpack.i.h.bf16 %v2141_v38  ;;  %v2142_v39 = vunpack.i.l.bf16 %v2141_v38 }
 0x2a8   : > { %v1115_v25 = vpack.c.bf16 %v2145_v24, %v2145_v24  ;;  %v1114_v18 = vpack.c.bf16 %v2142_v39, %v2142_v39 }
 0x2a9   : > { %v2148_v41 = vpop.trf.xlu0 }
 0x2aa   : > { %1970 = vmatmul.mubr.msk.bf16.vlgmr.msra.gmra.mrb[8].mxu0 %vm1130_vm4, %v1114_v18  ;;  %1976 = vmatmul.mubr.msk.bf16.vlgmr.msra.gmra.mrb[8].mxu1 %vm1130_vm4, %v1115_v25  ;;  %v2152_v42 = vunpack.i.h.bf16 %v2148_v41  ;;  %v2149_v44 = vunpack.i.l.bf16 %v2148_v41 }
 0x2ab   : > { %1980 = vmatpush3.bf16.msra.mxu0 %v3000_v20  ;;  %1986 = vmatpush3.bf16.msra.mxu1 %v3012_v40 }
 0x2ac   : > { %1981 = vmatprep.mubr.msk.bf16.mxu0 %vm2540_vm3, %v2539_v12  ;;  %1987 = vmatprep.mubr.msk.bf16.mxu1 %vm2540_vm3, %v2539_v12  ;;  %v1117_v47 = vpack.c.bf16 %v2152_v42, %v2152_v42  ;;  %v1116_v48 = vpack.c.bf16 %v2149_v44, %v2149_v44 }
 0x2ad   : > { %1991 = vmatprep.subr.bf16.mxu0 %v2539_v12  ;;  %1997 = vmatprep.subr.bf16.mxu1 %v2539_v12 }
 0x2b1   : > { %v2155_v45 = vpop.trf.xlu1 }
 0x2b2   : > { %1982 = vmatmul.mubr.msk.bf16.vlgmr.msra.gmra.mrb[12].mxu0 %vm1130_vm4, %v1116_v48  ;;  %1988 = vmatmul.mubr.msk.bf16.vlgmr.msra.gmra.mrb[12].mxu1 %vm1130_vm4, %v1117_v47  ;;  %v2159_v20 = vunpack.i.h.bf16 %v2155_v45  ;;  %v2156_v50 = vunpack.i.l.bf16 %v2155_v45 }
 0x2b3   : > { %1992 = vmatpush3.bf16.msra.mxu0 %v1320_v33  ;;  %1998 = vmatpush3.bf16.msra.mxu1 %v1366_v37 }
 0x2b4   : > { %1993 = vmatprep.mubr.msk.bf16.mxu0 %vm2540_vm3, %v2539_v12  ;;  %1999 = vmatprep.mubr.msk.bf16.mxu1 %vm2540_vm3, %v2539_v12  ;;  %v1119_v52 = vpack.c.bf16 %v2159_v20, %v2159_v20  ;;  %v1118_v51 = vpack.c.bf16 %v2156_v50, %v2156_v50 }
 0x2b5   : > { %2003 = vmatprep.subr.bf16.mxu0 %v2539_v12  ;;  %2009 = vmatprep.subr.bf16.mxu1 %v2539_v12  ;;  %v2162_v40 = vpop.trf.xlu1 }
 0x2b6   : > { %v2166_v53 = vunpack.i.h.bf16 %v2162_v40  ;;  %v2163_v43 = vunpack.i.l.bf16 %v2162_v40 }
 0x2b8   : > { %v1121_v54 = vpack.c.bf16 %v2166_v53, %v2166_v53  ;;  %v1120_v46 = vpack.c.bf16 %v2163_v43, %v2163_v43 }
 0x2ba   : > { %1994 = vmatmul.mubr.msk.bf16.vlgmr.msra.gmra.mrb[16].mxu0 %vm1130_vm4, %v1118_v51  ;;  %2000 = vmatmul.mubr.msk.bf16.vlgmr.msra.gmra.mrb[16].mxu1 %vm1130_vm4, %v1119_v52 }
 0x2bb   : > { %2004 = vmatpush3.bf16.msra.mxu0 %v1412_v32  ;;  %2010 = vmatpush3.bf16.msra.mxu1 %v1458_v36 }
 0x2bc   : > { %2005 = vmatprep.mubr.msk.bf16.mxu0 %vm2540_vm3, %v2539_v12  ;;  %2011 = vmatprep.mubr.msk.bf16.mxu1 %vm2540_vm3, %v2539_v12 }
 0x2bd   : > { %2015 = vmatprep.subr.bf16.mxu0 %v2539_v12 }
 0x2c2   : > { %2006 = vmatmul.mubr.msk.bf16.vlgmr.msra.gmra.mrb[20].mxu0 %vm1130_vm4, %v1120_v46  ;;  %2012 = vmatmul.mubr.msk.bf16.vlgmr.msra.gmra.mrb[20].mxu1 %vm1130_vm4, %v1121_v54 }
 0x2c3   : > { %2019 = vmatprep.mubr.msk.bf16.mxu0 %vm2540_vm3, %v2539_v12  ;;  %2016 = vmatpush3.bf16.msra.mxu0 %v2179_v56 }
 0x2c4   : > { %2017 = vmatprep.subr.bf16.mxu0 %v2539_v12 }
 0x2c7   : > { %2018 = vmatpush3.bf16.msra.mxu0 %v2180_v57 }
 0x37d   : > { %v1172_v3 = vpop.f32.mrb[8].mxu0  ;;  %v1218_v4 = vpop.f32.mrb[8].mxu1 }
 0x37e   : > { %v1512_v5 = vsel %vm3091_vm7, %v1172_v3, 0.0  ;;  %v1513_v12 = vsel %vm3091_vm7, %v1218_v4, 0.0  ;;  %v1971_v6 = vpop.f32.mrb[9].mxu0  ;;  %v1977_v7 = vpop.f32.mrb[9].mxu1 }
 0x37f   : > { %v1521_v8 = vsel %vm1520_vm8, %v1512_v5, 0.0  ;;  %v1528_v9 = vsel %vm1520_vm8, %v1513_v12, 0.0  ;;  %v1175_v10 = vpop.f32.mrb[10].mxu0  ;;  %v1221_v14 = vpop.f32.mrb[10].mxu1 }
 0x380   : > { %v1522_v16 = vrot.slane %v1521_v8, 4  ;;  %v1529_v19 = vrot.slane %v1528_v9, 4  ;;  %v1972_v21 = vpop.f32.mrb[11].mxu0  ;;  %v1978_v22 = vpop.f32.mrb[11].mxu1 }
 0x382   : > { %v1523_v49 = vadd.f32 %v1522_v16, %v1521_v8  ;;  %v1530_v59 = vadd.f32 %v1529_v19, %v1528_v9 }
 0x384   : > { %v1524_v55 = vrot.slane %v1523_v49, 2  ;;  %v1531_v62 = vrot.slane %v1530_v59, 2 }
 0x385   : > { %v1264_v26 = vpop.f32.mrb[12].mxu0  ;;  %v1310_v27 = vpop.f32.mrb[12].mxu1 }
 0x386   : > { %v1525_v28 = vadd.f32 %v1524_v55, %v1523_v49  ;;  %v1532_v11 = vadd.f32 %v1531_v62, %v1530_v59  ;;  %v1514_v23 = vsel %vm3091_vm7, %v1264_v26, 0.0  ;;  %v1515_v13 = vsel %vm3091_vm7, %v1310_v27, 0.0  ;;  %v1983_v29 = vpop.f32.mrb[13].mxu0  ;;  %v1989_v15 = vpop.f32.mrb[13].mxu1 }
 0x387   : > { %v1535_v30 = vsel %vm1520_vm8, %v1514_v23, 0.0  ;;  %v1542_v31 = vsel %vm1520_vm8, %v1515_v13, 0.0  ;;  %v1267_v32 = vpop.f32.mrb[14].mxu0  ;;  %v1313_v17 = vpop.f32.mrb[14].mxu1 }
 0x388   : > { %v1526_v33 = vrot.slane %v1525_v28, 1  ;;  %v1533_v34 = vrot.slane %v1532_v11, 1  ;;  %v1536_v35 = vrot.slane %v1535_v30, 4  ;;  %v1543_v36 = vrot.slane %v1542_v31, 4  ;;  %v1984_v37 = vpop.f32.mrb[15].mxu0  ;;  %v1990_v38 = vpop.f32.mrb[15].mxu1 }
 0x38a   : > { %v1527_v24 = vadd.f32 %v1526_v33, %v1525_v28  ;;  %v1534_v39 = vadd.f32 %v1533_v34, %v1532_v11  ;;  %v1537_v25 = vadd.f32 %v1536_v35, %v1535_v30  ;;  %v1544_v18 = vadd.f32 %v1543_v36, %v1542_v31 }
 0x38c   : > { %v1577_v41 = vpack.c.bf16 %v1527_v24, %v1527_v24  ;;  %v1578_v42 = vpack.c.bf16 %v1534_v39, %v1534_v39  ;;  %v1538_v44 = vrot.slane %v1537_v25, 2  ;;  %v1545_v47 = vrot.slane %v1544_v18, 2 }
 0x38d   : > { %v1356_v48 = vpop.f32.mrb[16].mxu0  ;;  %v1402_v45 = vpop.f32.mrb[16].mxu1 }
 0x38e   : > { %v1604_v20 = vunpack.c.l.b16 %v1577_v41  ;;  %v1605_v50 = vunpack.c.l.b16 %v1578_v42  ;;  %v1539_v40 = vadd.f32 %v1538_v44, %v1537_v25  ;;  %v1546_v52 = vadd.f32 %v1545_v47, %v1544_v18  ;;  %v1995_v51 = vpop.f32.mrb[17].mxu0  ;;  %v2001_v53 = vpop.f32.mrb[17].mxu1 }
 0x38f   : > { %v1516_v43 = vsel %vm3091_vm7, %v1356_v48, 0.0  ;;  %v1517_v54 = vsel %vm3091_vm7, %v1402_v45, 0.0  ;;  %v1359_v46 = vpop.f32.mrb[18].mxu0  ;;  %v1405_v56 = vpop.f32.mrb[18].mxu1 }
 0x390   : > { %v1613_v57 = vsel %vm1612_vm9, %v1605_v50, %v1604_v20  ;;  %v1540_v58 = vrot.slane %v1539_v40, 1  ;;  %v1547_v60 = vrot.slane %v1546_v52, 1  ;;  %v1549_v61 = vsel %vm1520_vm8, %v1516_v43, 0.0  ;;  %v1996_v63 = vpop.f32.mrb[19].mxu0  ;;  %v2002_v0 = vpop.f32.mrb[19].mxu1 }
 0x391   : > { %v1550_v1 = vrot.slane %v1549_v61, 4  ;;  %v1556_v3 = vsel %vm1520_vm8, %v1517_v54, 0.0 }
 0x392   : > { %v1541_v4 = vadd.f32 %v1540_v58, %v1539_v40  ;;  %v1548_v5 = vadd.f32 %v1547_v60, %v1546_v52  ;;  %v1557_v12 = vrot.slane %v1556_v3, 4 }
 0x393   : > { %v1551_v6 = vadd.f32 %v1550_v1, %v1549_v61 }
 0x394   : > { %v1579_v7 = vpack.c.bf16 %v1541_v4, %v1541_v4  ;;  %v1580_v8 = vpack.c.bf16 %v1548_v5, %v1548_v5  ;;  %v1558_v9 = vadd.f32 %v1557_v12, %v1556_v3 }
 0x395   : > { %v1552_v10 = vrot.slane %v1551_v6, 2  ;;  %v1448_v14 = vpop.f32.mrb[20].mxu0  ;;  %v1494_v16 = vpop.f32.mrb[20].mxu1 }
 0x396   : > { %v1606_v19 = vunpack.c.l.b16 %v1579_v7  ;;  %v1607_v21 = vunpack.c.l.b16 %v1580_v8  ;;  %v1559_v22 = vrot.slane %v1558_v9, 2  ;;  %v1518_v49 = vsel %vm3091_vm7, %v1448_v14, 0.0  ;;  %v2007_v59 = vpop.f32.mrb[21].mxu0  ;;  %v2013_v55 = vpop.f32.mrb[21].mxu1 }
 0x397   : > { %v1553_v62 = vadd.f32 %v1552_v10, %v1551_v6  ;;  %v1563_v26 = vsel %vm1520_vm8, %v1518_v49, 0.0  ;;  %v1519_v27 = vsel %vm3091_vm7, %v1494_v16, 0.0  ;;  %v1451_v28 = vpop.f32.mrb[22].mxu0  ;;  %v1497_v11 = vpop.f32.mrb[22].mxu1 }
 0x398   : > { %v1615_v23 = vsel %vm1614_vm10, %v1606_v19, %v1613_v57  ;;  %v1560_v13 = vadd.f32 %v1559_v22, %v1558_v9  ;;  %v1564_v29 = vrot.slane %v1563_v26, 4  ;;  %v1570_v15 = vsel %vm1520_vm8, %v1519_v27, 0.0  ;;  %v2008_v30 = vpop.f32.mrb[23].mxu0  ;;  %v2014_v31 = vpop.f32.mrb[23].mxu1  ;;  %v1902_v57 = vld [vmem:[#allocation14] ss:$0 sm:$0xff] }
 0x399   : > { %v1617_v32 = vsel %vm1616_vm11, %v1607_v21, %v1615_v23  ;;  %v1554_v17 = vrot.slane %v1553_v62, 1  ;;  %v1571_v33 = vrot.slane %v1570_v15, 4 }
 0x39a   : > { %v1561_v34 = vrot.slane %v1560_v13, 1  ;;  %v1565_v35 = vadd.f32 %v1564_v29, %v1563_v26 }
 0x39b   : > { %v1555_v36 = vadd.f32 %v1554_v17, %v1553_v62  ;;  %v1572_v37 = vadd.f32 %v1571_v33, %v1570_v15 }
 0x39c   : > { %v1562_v2 = vadd.f32 %v1561_v34, %v1560_v13  ;;  %v1566_v38 = vrot.slane %v1565_v35, 2 }
 0x39d   : > { %v1581_v24 = vpack.c.bf16 %v1555_v36, %v1555_v36  ;;  %v1573_v39 = vrot.slane %v1572_v37, 2 }
 0x39e   : > { %v1582_v25 = vpack.c.bf16 %v1562_v2, %v1562_v2  ;;  %v1567_v18 = vadd.f32 %v1566_v38, %v1565_v35 }
 0x39f   : > { %v1608_v41 = vunpack.c.l.b16 %v1581_v24  ;;  %v1574_v42 = vadd.f32 %v1573_v39, %v1572_v37 }
 0x3a0   : > { %v1609_v44 = vunpack.c.l.b16 %v1582_v25  ;;  %v1568_v47 = vrot.slane %v1567_v18, 1 }
 0x3a1   : > { %v1619_v48 = vsel %vm1618_vm12, %v1608_v41, %v1617_v32  ;;  %v1575_v45 = vrot.slane %v1574_v42, 1 }
 0x3a2   : > { %v1621_v20 = vsel %vm1620_vm13, %v1609_v44, %v1619_v48  ;;  %v1569_v50 = vadd.f32 %v1568_v47, %v1567_v18 }
 0x3a3   : > { %v1576_v40 = vadd.f32 %v1575_v45, %v1574_v42 }
 0x3a4   : > { %v1583_v52 = vpack.c.bf16 %v1569_v50, %v1569_v50 }
 0x3a5   : > { %v1584_v51 = vpack.c.bf16 %v1576_v40, %v1576_v40 }
 0x3a6   : > { %v1610_v53 = vunpack.c.l.b16 %v1583_v52 }
 0x3a7   : > { %v1611_v43 = vunpack.c.l.b16 %v1584_v51 }
 0x3a8   : > { %v1623_v54 = vsel %vm1622_vm14, %v1610_v53, %v1621_v20 }
 0x3a9   : > { %v1625_v46 = vsel %vm1624_vm15, %v1611_v43, %v1623_v54 }
 0x3aa   : > { %v1626_v56 = vpack.c.b16 %v1625_v46, %v1625_v46 }
 0x3ac   : > { %2020 = vmatmul.mubr.msk.bf16.vlgmr.msra.gmra.mrb[24].mxu0 %vm507_vm0, %v1626_v56 }
 0x47f   : > { %v1676_v58 = vpop.f32.mrb[24].mxu0 }
 0x480   : > { %v1677_v60 = vadd.f32 %v1902_v57, %v1676_v58  ;;  %v2021_v61 = vpop.f32.mrb[25].mxu0 }
 0x481   : > { %v1679_v63 = vpop.f32.mrb[26].mxu0 }
 0x482   : > { %1682 = vst [vmem:[%s444_s9] sm:$0xff] %v1677_v60  ;;  %v2022_v0 = vpop.f32.mrb[27].mxu0 }
 0x483   : > { %2454 = shalt.err (!%p2451_p3)
}
 0x484   : > { %s2455_s3 = scalar_lea.hbm %s3127_s20, 128  ;;  %s2459_s6 = scalar_lea.hbm %s3179_s8, 256 }
 0x485   : > { %p2456_p12 = scmp.ne.s32.totalorder %s3127_s20, %s2455_s3  ;;  %p2460_p0 = scmp.lt.u32.totalorder %s3127_s20, %s3179_s8 }
 0x486   : > { %p2461_p6 = scmp.lt.u32.totalorder %s2459_s6, %s2455_s3  ;;  %p2463_p4 = scmp.lt.u32.totalorder %s2455_s3, %s3127_s20 }
 0x487   : > { %p2457_p1 = pnand %p2456_p12, %p3219_p10 }
 0x488   : > { %p2462_p2 = por %p2461_p6, %p2460_p0 }
 0x489   : > { %p2458_p13 = pneg %p2457_p1 }
 0x48a   : > { %p2464_p5 = por %p2463_p4, %p2462_p2 }
 0x48c   : > { %p2465_p7 = pnand %p2464_p5, %p2458_p13 }
 0x48e   : > { %2468 = shalt.err (!%p2465_p7)
}
 0x48f   : > { %2051 = dma.vmem_to_hbm [thread:$0]  (%p3219_p10), %s3129_s23, 128, %s3127_s20, %s1684_s5  }
 0x490 PF: > { %s1709_s13 = sand.u32 1, %s2515_s27   ;;  %p3220_p9 = scmp.ne.s32.totalorder %s3205_s17, 0 }
 0x491   : > { %p3221_p8 = scmp.ge.s32.totalorder %s2527_s30, 2  ;;  %s1710_s19 = scalar_lea.sflag [#allocation4], %s1709_s13 }
 0x493   : > { %p2080_p11 = pnand %p3221_p8, %p3220_p9 }
 0x495   : > { %2510 = dma.done.wait (!%p2080_p11), %s1710_s19, 128  }
 0x496   : > { %2512 = vsyncadd (!%p2080_p11), %s1710_s19, 4294967168  ;;  %p27_p3 = scmp.ge.s32.totalorder %s2774_s15, 4   ;;  %s3222_s27 = smov %s2519_s28 }
 0x497   : > { %s3223_s28 = smov %s2523_s29  ;;  %s3224_s29 = smov %s2785_s10 }
 0x498   : > { %s3225_s30 = smov %s2774_s15  ;;  %29 = sbr.rel (!%p27_p3) target bundleno = 16 (0x10), region = 134 }
 0x49f   :  { %1715 = vsyncpa [#allocation3], 1 }
 0x4a0   :  { %1717 = vsyncpa [#allocation3 + $0x1], 1 }
 0x4a1   :  { %1718 = vsyncpa [#allocation6], 1 }
 0x4a2   :  { %1720 = vsyncpa [#allocation6 + $0x1], 1 }
 0x4a3   :  { %1721 = vsyncpa [#allocation9], 1 }
 0x4a4   :  { %1722 = vsyncpa [#allocation12], 1 }
 0x4a5   :  { %1723 = vsyncpa [#allocation15], 1 }
 0x4a6   :  { %1724 = vsyncpa [#allocation4], 1 }
 0x4a7   :  { %1726 = vsyncpa [#allocation4 + $0x1], 1 }

</bundles_post_ra>
